<compile_context>
chip_gen: v5e
topology: v5e:2x2
jax: 0.10.0
libtpu: 0.0.40
codegen_flags: <defaults>
</compile_context>

<pallas_src>
import jax
import jax.numpy as jnp
from jax.experimental import pallas as pl
from jax.experimental.pallas import tpu as pltpu


def _round_up(x, m):
    return ((x + m - 1) // m) * m


def _vmem_budget_bytes():
    """~75% of per-core VMEM; falls back to the smallest generation (v7x, 64 MiB)."""
    cap = 64 << 20
    try:
        cap = int(getattr(pltpu.get_tpu_info(), "vmem_capacity_bytes", cap))
    except Exception:
        pass
    return (cap * 3) // 4


def _downsample_conv_kernel(x_ref, w_ref, b_ref, o_ref):
    """One grid step: (Cout, K) @ (K, TS) + bias -> (Cout, TS), NCHW-ready block."""
    acc = jnp.dot(w_ref[...], x_ref[0],
                  preferred_element_type=jnp.float32)          # MXU, f32 accumulate
    o_ref[0] = (acc + b_ref[...]).astype(o_ref.dtype)          # fused bias + final cast


def downsample_block_forward(x_nchw, w_oihw, bias, scale_factor=2, *,
                             use_bf16=True, max_spatial_tile=2048):
    """Pallas implementation of DownsampleBlock.forward (NCHW in / NCHW out)."""
    B, C, H, W = x_nchw.shape
    s = int(scale_factor)
    assert H % s == 0 and W % s == 0, (x_nchw.shape, s)
    Ho, Wo = H // s, W // s
    S = Ho * Wo
    K = C * s * s
    Cout = w_oihw.shape[0]
    assert w_oihw.shape == (Cout, K, 1, 1), w_oihw.shape

    compute_dtype = jnp.bfloat16 if use_bf16 else jnp.float32
    out_dtype = x_nchw.dtype

    # Space-to-depth 'b c (h p1) (w p2) -> b (c p1 p2) (h w)' — layout plumbing in
    # the wrapper; the bf16 cast fuses into this transpose, halving DMA bytes.
    # Channel order k = c*s*s + p1*s + p2 matches the einops Rearrange / Conv2d.
    xr = x_nchw.reshape(B, C, Ho, s, Wo, s)
    x_s2d = jnp.transpose(xr, (0, 1, 3, 5, 2, 4)).reshape(B, K, S)
    x_s2d = x_s2d.astype(compute_dtype)

    wmat = w_oihw.reshape(Cout, K).astype(compute_dtype)        # (Cout, K)
    bias2 = bias.reshape(Cout, 1).astype(jnp.float32)           # (Cout, 1), f32 add

    bytes_in = jnp.dtype(compute_dtype).itemsize
    bytes_out = jnp.dtype(out_dtype).itemsize
    budget = _vmem_budget_bytes()

    # --- spatial (lane) tile: full extent for small S, else a multiple of 128
    #     derived from the VMEM budget (double-buffered input/output tiles).
    if S <= 512:
        TS = S                                   # block dim == full array dim: allowed
    else:
        fixed = 2 * Cout * K * bytes_in + 2 * Cout * 4            # weights + bias
        per_col = 2 * K * bytes_in + 2 * Cout * bytes_out         # x + out, dbl-buffered
        ts = (budget - fixed) // max(per_col, 1)
        TS = max(128, min((ts // 128) * 128, max_spatial_tile, _round_up(S, 128)))
    grid_s = pl.cdiv(S, TS)
    # v7x has 2 TensorCores: keep >= 2 parallel grid steps when there is enough work.
    if B * grid_s < 2 and S >= 256:
        TS = max(128, _round_up(pl.cdiv(S, 2), 128))
        grid_s = pl.cdiv(S, TS)

    # Explicit VMEM limit derived from the actual double-buffered footprint
    # (no hard 32 MiB clamp), capped by the per-generation budget.
    vmem_bytes = (2 * K * TS * bytes_in          # activation tile, double-buffered
                  + 2 * Cout * TS * bytes_out    # output tile, double-buffered
                  + 2 * Cout * K * bytes_in      # weights (resident, default 2 bufs)
                  + 2 * Cout * 4)                # bias
    vmem_limit = int(min(budget, max(int(vmem_bytes * 1.5), 16 << 20)))

    out = pl.pallas_call(
        _downsample_conv_kernel,
        out_shape=jax.ShapeDtypeStruct((B, Cout, S), out_dtype),
        grid_spec=pltpu.PrefetchScalarGridSpec(
            num_scalar_prefetch=0,
            grid=(B, grid_s),
            in_specs=[
                pl.BlockSpec((1, K, TS), lambda b, t: (b, 0, t)),   # space-to-depth acts
                pl.BlockSpec((Cout, K), lambda b, t: (0, 0)),       # conv weight (const)
                pl.BlockSpec((Cout, 1), lambda b, t: (0, 0)),       # conv bias (const)
            ],
            out_specs=pl.BlockSpec((1, Cout, TS), lambda b, t: (b, 0, t)),
        ),
        compiler_params=pltpu.CompilerParams(
            dimension_semantics=("parallel", "parallel"),           # megacore-shardable
            vmem_limit_bytes=vmem_limit),
    )(x_s2d, wmat, bias2)

    return out.reshape(B, Cout, Ho, Wo)          # free reshape — already NCHW-ordered


def downsample_block_reference(x_nchw, w_oihw, bias, scale_factor=2):
    """Pure-JAX reference mirroring the PyTorch module exactly (f32, HIGHEST)."""
    B, C, H, W = x_nchw.shape
    s = int(scale_factor)
    Ho, Wo = H // s, W // s
    Cout = w_oihw.shape[0]
    xr = x_nchw.reshape(B, C, Ho, s, Wo, s)
    xr = jnp.transpose(xr, (0, 1, 3, 5, 2, 4)).reshape(B, C * s * s, Ho, Wo)
    wmat = w_oihw.reshape(Cout, C * s * s)
    out = jnp.einsum('bkhw,ok->bohw', xr, wmat,
                     precision=jax.lax.Precision.HIGHEST)
    return out + bias.reshape(1, Cout, 1, 1)


if __name__ == "__main__":
    B, Cin, H, W = 2, 4, 16, 16
    scale_factor = 2
    Cout = 8                                     # dim_out

    key = jax.random.PRNGKey(0)
    kx, kw, kb = jax.random.split(key, 3)
    x = jax.random.normal(kx, (B, Cin, H, W), dtype=jnp.float32)
    # Conv2d(dim_in * s * s, dim_out, kernel_size=1) parameters.
    w_conv = 0.1 * jax.random.normal(
        kw, (Cout, Cin * scale_factor * scale_factor, 1, 1), dtype=jnp.float32)
    b_conv = 0.1 * jax.random.normal(kb, (Cout,), dtype=jnp.float32)

    ref = downsample_block_reference(x, w_conv, b_conv, scale_factor)

    # f32 path (tight tolerance against the PyTorch-equivalent reference).
    out_f32 = jax.block_until_ready(
        downsample_block_forward(x, w_conv, b_conv, scale_factor, use_bf16=False))
    assert out_f32.shape == (B, Cout, H // scale_factor, W // scale_factor), out_f32.shape
    assert out_f32.dtype == x.dtype
    assert jnp.allclose(out_f32, ref, rtol=2e-3, atol=2e-3), \
        float(jnp.max(jnp.abs(out_f32 - ref)))

    # bf16-operand path (recommended perf config on v5e/v6e/v7x), f32 accumulate.
    out_bf16 = jax.block_until_ready(
        downsample_block_forward(x, w_conv, b_conv, scale_factor, use_bf16=True))
    assert out_bf16.shape == (B, Cout, H // scale_factor, W // scale_factor)
    assert jnp.allclose(out_bf16, ref, rtol=2e-2, atol=2e-2), \
        float(jnp.max(jnp.abs(out_bf16 - ref)))

    print("KERNEL_OK")
</pallas_src>

<mosaic_0001>
module attributes {stable_mosaic.version = 11 : i64} {
  func.func @_downsample_conv_kernel(%arg0: i32, %arg1: i32, %arg2: memref<1x16x64xf32, #tpu.memory_space<vmem>>, %arg3: memref<8x16xf32, #tpu.memory_space<vmem>>, %arg4: memref<8x1xf32, #tpu.memory_space<vmem>>, %arg5: memref<1x8x64xf32, #tpu.memory_space<vmem>>) attributes {dimension_semantics = [#tpu.dimension_semantics<parallel>, #tpu.dimension_semantics<parallel>], iteration_bounds = array<i64: 2, 1>, scalar_prefetch = 0 : i64, scratch_operands = 0 : i64, tpu.core_type = #tpu.core_type<tc>, window_params = [{transform_indices = @transform_0, window_bounds = array<i64: 1, 16, 64>}, {pipeline_mode = #tpu.pipeline_mode<synchronous>, transform_indices = @transform_1, window_bounds = array<i64: 8, 16>}, {pipeline_mode = #tpu.pipeline_mode<synchronous>, transform_indices = @transform_2, window_bounds = array<i64: 8, 1>}, {transform_indices = @transform_3, window_bounds = array<i64: 1, 8, 64>}]} {
    %c0 = arith.constant 0 : index
    %c0_0 = arith.constant 0 : index
    %0 = vector.load %arg3[%c0, %c0_0] : memref<8x16xf32, #tpu.memory_space<vmem>>, vector<8x16xf32>
    %c0_1 = arith.constant 0 : index
    %c0_2 = arith.constant 0 : index
    %c0_3 = arith.constant 0 : index
    %1 = vector.load %arg2[%c0_1, %c0_2, %c0_3] : memref<1x16x64xf32, #tpu.memory_space<vmem>>, vector<1x16x64xf32>
    %2 = vector.shape_cast %1 : vector<1x16x64xf32> to vector<16x64xf32>
    %cst = arith.constant dense<0.000000e+00> : vector<8x64xf32>
    %3 = tpu.matmul %0, %2, %cst {dimension_numbers = #tpu.dot_dimension_numbers<[1], [0], [0], [1], [0, 0, 1, 1], [], []>} : vector<8x16xf32>, vector<16x64xf32>, vector<8x64xf32> -> vector<8x64xf32>
    %c0_4 = arith.constant 0 : index
    %c0_5 = arith.constant 0 : index
    %4 = vector.load %arg4[%c0_4, %c0_5] : memref<8x1xf32, #tpu.memory_space<vmem>>, vector<8x1xf32>
    %5 = vector.broadcast %4 : vector<8x1xf32> to vector<8x64xf32>
    %6 = arith.addf %3, %5 : vector<8x64xf32>
    %c0_6 = arith.constant 0 : index
    %c0_7 = arith.constant 0 : index
    %c0_8 = arith.constant 0 : index
    %7 = vector.load %arg5[%c0_6, %c0_7, %c0_8] : memref<1x8x64xf32, #tpu.memory_space<vmem>>, vector<1x8x64xf32>
    %8 = vector.shape_cast %7 : vector<1x8x64xf32> to vector<8x64xf32>
    %9 = vector.shape_cast %6 : vector<8x64xf32> to vector<1x8x64xf32>
    tpu.vector_store %arg5[%c0_6, %c0_7, %c0_8], %9 {strides = array<i32>} : memref<1x8x64xf32, #tpu.memory_space<vmem>>, vector<1x8x64xf32>,
    return
  }
  func.func @transform_0(%arg0: i32, %arg1: i32) -> (i32, i32, i32) {
    %c0_i32 = arith.constant 0 : i32
    %c0_i32_0 = arith.constant 0 : i32
    return %arg0, %c0_i32, %arg1 : i32, i32, i32
  }
  func.func @transform_1(%arg0: i32, %arg1: i32) -> (i32, i32) {
    %c0_i32 = arith.constant 0 : i32
    %c0_i32_0 = arith.constant 0 : i32
    %c0_i32_1 = arith.constant 0 : i32
    return %c0_i32, %c0_i32_0 : i32, i32
  }
  func.func @transform_2(%arg0: i32, %arg1: i32) -> (i32, i32) {
    %c0_i32 = arith.constant 0 : i32
    %c0_i32_0 = arith.constant 0 : i32
    %c0_i32_1 = arith.constant 0 : i32
    return %c0_i32, %c0_i32_0 : i32, i32
  }
  func.func @transform_3(%arg0: i32, %arg1: i32) -> (i32, i32, i32) {
    %c0_i32 = arith.constant 0 : i32
    %c0_i32_0 = arith.constant 0 : i32
    return %arg0, %c0_i32, %arg1 : i32, i32, i32
  }
}

</mosaic_0001>

<bundles_post_ra>
// kernel: tpu_custom_call.1
= control target key start
LH: loop header
LB: loop body
LE: loop exit
PB: predicated region body
PF: predicated region fallthrough
CT: control target
= control target key end

     0   :  { %8 = vsyncpa [#allocation3], 0  ;;  %s687_s0 = inlined_call_operand.hbm [shape: f32[2,16,64], index: 0, kind: input, shape index: {}]   ;;  %s688_s1 = inlined_call_operand.vmem [shape: f32[8,16], index: 1, kind: input, shape index: {}]   ;;  %s689_s2 = inlined_call_operand.vmem [shape: f32[8,1], index: 2, kind: input, shape index: {}]   ;;  %s690_s3 = inlined_call_operand.hbm [shape: f32[2,8,64], index: 3, kind: output, shape index: {}]  }
   0x1   :  { %10 = vsyncpa [#allocation3 + $0x1], 0 }
   0x2   :  { %11 = vsyncpa [#allocation4], 0 }
   0x3   :  { %13 = vsyncpa [#allocation4 + $0x1], 0  ;;  %s560_s12 = smov 0   ;;  %s562_s13 = smov 0  }
   0x4   :  { %s564_s14 = smov 0   ;;  %s566_s15 = smov 0  }
   0x5   :  { %s568_s16 = smov 0   ;;  %s570_s17 = smov 0  }
   0x6 LB: > { %s341_s18 = sadd.s32 4294967295, %s535_s17   ;;  %s342_s19 = sadd.s32 4294967294, %s535_s17   ;;  %s535_s17 = sphi %s570_s17, %s19_s17   ;;  %s531_s16 = sphi %s568_s16, %s699_s16   ;;  %s527_s15 = sphi %s566_s15, %s698_s15   ;;  %s523_s14 = sphi %s564_s14, %s697_s14   ;;  %s519_s13 = sphi %s562_s13, %s696_s13   ;;  %s515_s12 = sphi %s560_s12, %s695_s12  }
   0x7   : > { %s31_s20 = sadd.s32 1, %s531_s16  ;;  %s40_s21 = sadd.s32 1, %s523_s14 }
   0x8   : > { %p33_p0 = scmp.ge.s32.totalorder %s31_s20, 2  ;;  %p47_p1 = scmp.ne.s32.totalorder %s523_s14, %s519_s13 }
   0x9   : > { %p48_p2 = scmp.eq.s32.totalorder %s535_s17, 0  ;;  %p53_p3 = scmp.ne.s32.totalorder %s519_s13, %s515_s12 }
   0xa   : > { %s701_s20 = smov (%p33_p0, %s31_s20), 0  ;;  %p54_p5 = scmp.eq.s32.totalorder %s341_s18, 0 }
   0xb   : > { %p601_p4 = por %p48_p2, %p47_p1  ;;  %s35_s23 = ssub.s32 %s531_s16, %s701_s20 }
   0xc   : > { %p121_p6 = scmp.eq.s32.totalorder %s341_s18, 1  ;;  %p38_p7 = scmp.eq.s32.totalorder %s35_s23, 0 }
   0xd   : > { %p607_p8 = por %p54_p5, %p53_p3  ;;  %p127_p10 = scmp.eq.s32.totalorder %s342_s19, 1 }
   0xe   : > { %p611_p9 = por %p121_p6, %p47_p1  ;;  %p344_p12 = scmp.ge.s32.totalorder %s535_s17, 2 }
   0xf   : > { %s616_s26 = scalar_select %p38_p7, %s523_s14, %s40_s21  }
  0x10   : > { %p618_p11 = por %p127_p10, %p53_p3  ;;  %p369_p13 = scmp.lt.s32.totalorder %s535_s17, 2 }
  0x11   : > { %s153_s28 = sand.u32 1, %s523_s14   ;;  %s356_s30 = sshll.u32 %s531_s16, 4 }
  0x12   : > { %s345_s29 = sshll.u32 %s153_s28, 4  ;;  %s163_s6 = scalar_lea.hbm %s687_s0, %s356_s30 }
  0x13   : > { %s157_s7 = scalar_lea.vmem [#allocation2], %s345_s29  ;;  %s164_s9 = sshll.u32 %s163_s6, 4  ;;  %s165_s9 = int_to_ptr.hbm [resolvable:$true] %s164_s9 }
  0x14   : > { %s166_s8 = sshll.u32 %s157_s7, 4  ;;  %p362_p0 = pnand %p369_p13, %p601_p4  ;;  %s167_s8 = int_to_ptr.vmem [resolvable:$true] %s166_s8 }
  0x15   : > { %p348_p1 = scmp.ge.s32.totalorder %s535_s17, 1  ;;  %s154_s10 = scalar_lea.sflag [#allocation3], %s153_s28 }
  0x16   : > { %s537_s11 = smov 128   ;;  %s538_s18 = smov 8  }
  0x17   : > { %364 = dma.hbm_to_vmem [thread:$0]  (!%p362_p0), %s165_s9, 256, %s167_s8, %s154_s10, %s537_s11, %s537_s11, %s538_s18  }
  0x18   : > { %p174_p2 = scmp.lt.s32.totalorder %s535_s17, 3 }
  0x1a   : > { %p175_p3 = pnand %p348_p1, %p174_p2 }
  0x1b   : > { %s634_s19 = sand.u32 (!%p175_p3), 1, %s519_s13  }
  0x1c   : > { %178 = sbr.rel (%p175_p3) target bundleno = 169 (0xa9), region = 32  ;;  %s349_s21 = sshll.u32 (!%p175_p3), %s634_s19, 4 }
  0x1d   : > { %s181_s23 = scalar_lea.sflag (!%p175_p3), [#allocation3], %s634_s19  ;;  %s184_s29 = scalar_lea.vmem (!%p175_p3), [#allocation2], %s349_s21 }
  0x21   : > { %506 = dma.done.wait (%p607_p8), %s181_s23, 256  }
  0x22   : > { %508 = vsyncadd (%p607_p8), %s181_s23, 4294967040  ;;  %v539_v0 = vmov 0   ;;  %v210_v1 = vld [vmem:[%s184_s29 + $0x8] sm:$0xff]  ;;  %v209_v2 = vld [vmem:[%s184_s29] sm:$0xff]  ;;  %vm217_vm0 = vcmask 130048   ;;  %s350_s24 = sshll.u32 %s634_s19, 3 }
  0x23   : > { %422 = vset.pattern.permute.xlu0 %v539_v0  ;;  %235 = vmatpush.msra.mxu0 %v210_v1  ;;  %v208_v3 = vld [vmem:[%s688_s1] sm:$0xff]  ;;  %s353_s5 = sshll.u32 %s527_s15, 3  ;;  %s207_s9 = scalar_lea.vmem [#allocation5], %s350_s24  ;;  %vm241_vm1 = vcmask 523264  }
  0x24   : > { %v211_v4 = vld [vmem:[%s689_s2] sm:$0xff]  ;;  %s255_s8 = scalar_lea.hbm %s690_s3, %s353_s5  ;;  %s257_s10 = sshll.u32 %s207_s9, 4  ;;  %s258_s10 = int_to_ptr.vmem [resolvable:$true] %s257_s10 }
  0x25   : > { %214 = vperm.xlu0 %422, %v211_v4   ;;  %236 = vmatpush.msra.mxu0 %v209_v2  ;;  %s259_s11 = sshll.u32 %s255_s8, 4  ;;  %s244_s18 = scalar_lea.sflag [#allocation4], %s634_s19  ;;  %s260_s11 = int_to_ptr.hbm [resolvable:$true] %s259_s11 }
  0x26   : > { %351 = vmatmul.msk.f32.vlgmr.msra.gmra.mxu0 %vm217_vm0, %v208_v3  ;;  %s467_s21 = sshra.s32 %s260_s11, 4  ;;  %s473_s22 = scalar_lea.hbm %s690_s3, 16  ;;  %s468_s21 = int_to_ptr.hbm [resolvable:$true] %s467_s21 }
  0x27   : > { %s469_s23 = scalar_lea.hbm %s468_s21, 8  ;;  %p474_p7 = scmp.lt.s32.totalorder %s468_s21, %s690_s3 }
  0x28   : > { %p470_p4 = scmp.ne.s32.totalorder %s468_s21, %s469_s23  ;;  %p475_p8 = scmp.lt.s32.totalorder %s473_s22, %s469_s23 }
  0x2a   : > { %p471_p5 = pnand %p470_p4, %p611_p9  ;;  %p476_p10 = por %p475_p8, %p474_p7 }
  0x2c   : > { %p472_p6 = pneg %p471_p5 }
  0x2e   : > { %p477_p13 = pnand %p476_p10, %p472_p6 }
  0x97   : > { %v215_v5 = vpop.permute.xlu0 %214 }
  0xa3   : > { %v238_v6 = vpop.f32.mrf.mxu0 }
  0xa4   : > { %v239_v7 = vadd.f32 %v238_v6, %v215_v5 }
  0xa6   : > { %242 = vst.msk [vmem:[%s207_s9] sm:$0xff] %vm241_vm1, %v239_v7 }
  0xa7   : > { %480 = shalt.err (!%p477_p13)
}
  0xa8   : > { %359 = dma.vmem_to_hbm [thread:$0]  (%p611_p9), %s258_s10, 128, %s260_s11, %s244_s18  }
  0xa9 PF: > { %s271_s19 = sand.u32 1, %s515_s12   ;;  %p366_p0 = pnand %p344_p12, %p618_p11 }
  0xaa   : > { %s272_s4 = scalar_lea.sflag [#allocation4], %s271_s19 }
  0xab   : > { %p367_p1 = pneg %p366_p0 }
  0xad   : > { %510 = dma.done.wait (%p367_p1), %s272_s4, 128  }
  0xae   : > { %512 = vsyncadd (%p367_p1), %s272_s4, 4294967168  ;;  %s19_s17 = sadd.s32 1, %s535_s17   ;;  %s695_s12 = smov %s519_s13 }
  0xaf   : > { %p16_p2 = scmp.ge.s32.totalorder %s19_s17, 4   ;;  %s696_s13 = smov %s523_s14 }
  0xb0   : > { %s697_s14 = smov %s616_s26  ;;  %s698_s15 = smov %s531_s16 }
  0xb1   : > { %s699_s16 = smov %s701_s20  ;;  %18 = sbr.rel (!%p16_p2) target bundleno = 6 (0x6), region = 77 }
  0xb6   :  { %278 = vsyncpa [#allocation3], 1 }
  0xb7   :  { %280 = vsyncpa [#allocation3 + $0x1], 1 }
  0xb8   :  { %281 = vsyncpa [#allocation4], 1 }
  0xb9   :  { %283 = vsyncpa [#allocation4 + $0x1], 1 }

</bundles_post_ra>
